<compile_context>
chip_gen: v7x
topology: tpu7x:2x2x1
jax: 0.10.0
libtpu: 0.0.40
codegen_flags: <defaults>
</compile_context>

<pallas_src>
import jax
import jax.numpy as jnp
from jax.experimental import pallas as pl
from jax.experimental.pallas import tpu as pltpu

_LANE = 128                            # vreg lane width  -> last-dim alignment
_MIN_VMEM_LIMIT = 32 * 1024 * 1024     # never pass a smaller scoped-VMEM limit
_USABLE_FRACTION = 0.7                 # fraction of the budget tiles may occupy
_PARALLEL_SPLIT_MIN_FLOPS = 1 << 27    # only split M for multi-TC above this work


def _round_up(x, m):
    return ((x + m - 1) // m) * m


def _pad2d(x, rows, cols):
    r, c = x.shape
    if r == rows and c == cols:
        return x                       # common aligned case: no HBM copy at all
    return jnp.pad(x, ((0, rows - r), (0, cols - c)))


def _hw_info():
    """(vmem_capacity_bytes, num_tensorcores) — best-effort, safe fallbacks."""
    cap = 64 * 1024 * 1024             # conservative default: v7x per-TC VMEM
    cores = 1
    try:
        info = pltpu.get_tpu_info()
        cap = int(getattr(info, "vmem_capacity_bytes", cap)) or cap
        for name in ("num_tensorcores", "num_cores", "tensorcore_count", "core_count"):
            v = getattr(info, name, None)
            if v:
                cores = int(v)
                break
    except Exception:
        pass
    try:
        dev = jax.devices()[0]
        for name in ("num_cores", "core_count"):
            v = getattr(dev, name, None)
            if v:
                cores = max(cores, int(v))
                break
    except Exception:
        pass
    return cap, cores


def _pick_tile(extent, align, target):
    """Pick a tile for one axis.  `extent` is already a multiple of `align`.

    Among tiles that are multiples of `align` and <= min(target, extent),
    minimize (#tiles, padding, -tile): biggest tiles first, least padding next.
    Padding is zero whenever a good divisor exists and otherwise bounded by
    (#tiles * align).  Returns (tile, padded_extent)."""
    cap = max(align, min(target, extent))
    cap = (cap // align) * align
    best_key, best = None, (align, extent)
    t = align
    while t <= cap:
        n = -(-extent // t)
        waste = n * t - extent
        key = (n, waste, -t)
        if best_key is None or key < best_key:
            best_key, best = key, (t, n * t)
        t += align
    return best


def _tile_targets(usable_bytes, in_itemsize, out_itemsize):
    """Largest tile targets whose worst-case double-buffered footprint fits."""
    ladder = ((1024, 1024, 1024), (1024, 512, 1024), (512, 512, 1024),
              (512, 512, 512), (512, 256, 512), (256, 256, 512),
              (256, 256, 256), (256, 128, 256), (128, 128, 256))
    for tm, tn, tj in ladder:
        foot = (2 * in_itemsize * (tm * tj + tj * tn)   # double-buffered A, W tiles
                + 2 * out_itemsize * tm * tn            # double-buffered out tile
                + 4 * tm * tn)                          # worst-case f32 accumulator
        if foot <= usable_bytes:
            return tm, tn, tj
    return 128, 128, 128


# ----------------------------------------------------------------------------
# Kernels
# ----------------------------------------------------------------------------
def _fast_matmul_kernel(a_ref, w_ref, o_ref):
    # Full contraction in one MXU pass per (i, j) tile; no accumulator needed.
    o_ref[...] = jnp.dot(a_ref[...], w_ref[...],
                         preferred_element_type=jnp.float32).astype(o_ref.dtype)


def _reduce_matmul_f32_kernel(a_ref, w_ref, o_ref):
    # f32 output: accumulate directly into the resident output block (its
    # index_map ignores k) — no scratch, no final copy/cast.
    @pl.when(pl.program_id(2) == 0)
    def _init():
        o_ref[...] = jnp.zeros_like(o_ref)

    o_ref[...] += jnp.dot(a_ref[...], w_ref[...],
                          preferred_element_type=jnp.float32)


def _reduce_matmul_acc_kernel(a_ref, w_ref, o_ref, acc_ref):
    # Narrow output dtypes: accumulate in an f32 scratch, cast once at the end.
    k = pl.program_id(2)

    @pl.when(k == 0)
    def _init():
        acc_ref[...] = jnp.zeros_like(acc_ref)

    acc_ref[...] += jnp.dot(a_ref[...], w_ref[...],
                            preferred_element_type=jnp.float32)

    @pl.when(k == pl.num_programs(2) - 1)
    def _store():
        o_ref[...] = acc_ref[...].astype(o_ref.dtype)


# ----------------------------------------------------------------------------
# 2-D matmul dispatcher: (M, J) @ (J, K) -> (M, K)
# ----------------------------------------------------------------------------
def _matmul_2d(a2, w, out_dtype, *, vmem_budget_bytes=None):
    M, J = a2.shape
    J2, K = w.shape
    assert J == J2, "contracted dims must match"
    in_item = jnp.dtype(a2.dtype).itemsize
    out_item = jnp.dtype(out_dtype).itemsize

    cap, cores = _hw_info()
    budget = int(vmem_budget_bytes) if vmem_budget_bytes else (3 * cap) // 4
    usable = int(budget * _USABLE_FRACTION)
    vmem_limit = max(budget, _MIN_VMEM_LIMIT)

    # Alignment-only padding (bf16 packs 16 rows per sublane tile, f32 packs 8).
    align_m = 16 if in_item == 2 else 8
    Ma = _round_up(M, align_m)
    Ja = _round_up(J, _LANE)
    Ka = _round_up(K, _LANE)

    tm_t, tn_t, tj_t = _tile_targets(usable, in_item, out_item)
    TM, Mp = _pick_tile(Ma, align_m, tm_t)
    TN, Kp = _pick_tile(Ka, _LANE, tn_t)

    # Multi-TensorCore chips (v7x): expose >= 2 parallel tiles when there is
    # enough work for the split to be worth it.
    flops = 2 * M * J * K
    if (cores >= 2 and (Mp // TM) * (Kp // TN) < 2
            and Ma >= 2 * align_m and flops >= _PARALLEL_SPLIT_MIN_FLOPS):
        TM, Mp = _pick_tile(Ma, align_m, max(align_m, (Ma // 2 // align_m) * align_m))

    grid_m, grid_n = Mp // TM, Kp // TN

    # ---- fast (J-resident) path: whole contraction in VMEM ------------------
    # A block index is unchanged across j -> kept resident (no re-DMA); no
    # accumulator, no k-loop per-step overhead.
    fast_foot = 2 * in_item * (TM * Ja + Ja * TN) + 2 * out_item * TM * TN
    if fast_foot <= usable:
        Jp = Ja
        a2p = _pad2d(a2, Mp, Jp)                 # no-op when M, J already aligned
        wp = _pad2d(w, Jp, Kp)
        cost = pl.CostEstimate(
            flops=flops, transcendentals=0,
            bytes_accessed=(Mp * Jp * in_item                # A read once
                            + Jp * Kp * in_item * grid_m     # W re-read per M tile
                            + Mp * Kp * out_item))
        out = pl.pallas_call(
            _fast_matmul_kernel,
            out_shape=jax.ShapeDtypeStruct((Mp, Kp), out_dtype),
            grid_spec=pltpu.PrefetchScalarGridSpec(
                num_scalar_prefetch=0,
                grid=(grid_m, grid_n),
                in_specs=[pl.BlockSpec((TM, Jp), lambda i, j: (i, 0)),
                          pl.BlockSpec((Jp, TN), lambda i, j: (0, j))],
                out_specs=pl.BlockSpec((TM, TN), lambda i, j: (i, j)),
            ),
            compiler_params=pltpu.CompilerParams(
                dimension_semantics=("parallel", "parallel"),
                vmem_limit_bytes=vmem_limit),
            cost_estimate=cost,
        )(a2p, wp)
        return out[:M, :K]

    # ---- tiled J-reduction path ---------------------------------------------
    TJ, Jp = _pick_tile(Ja, _LANE, tj_t)
    grid_k = Jp // TJ
    a2p = _pad2d(a2, Mp, Jp)                     # zero pad of J is inert in the dot
    wp = _pad2d(w, Jp, Kp)
    cost = pl.CostEstimate(
        flops=flops, transcendentals=0,
        bytes_accessed=(Mp * Jp * in_item * grid_n           # A re-read per N tile
                        + Jp * Kp * in_item * grid_m         # W re-read per M tile
                        + Mp * Kp * out_item))

    needs_acc = jnp.dtype(out_dtype) != jnp.dtype(jnp.float32)
    kernel = _reduce_matmul_acc_kernel if needs_acc else _reduce_matmul_f32_kernel
    scratch = [pltpu.VMEM((TM, TN), jnp.float32)] if needs_acc else []

    # NOTE(v5e): if profiling shows exposed DMA in the k loop (f32 inputs, lower
    # HBM BW), add pipeline_mode=pl.Buffered(3) on the two in_specs and re-sweep.
    out = pl.pallas_call(
        kernel,
        out_shape=jax.ShapeDtypeStruct((Mp, Kp), out_dtype),
        grid_spec=pltpu.PrefetchScalarGridSpec(
            num_scalar_prefetch=0,
            grid=(grid_m, grid_n, grid_k),                   # reduction axis last
            in_specs=[pl.BlockSpec((TM, TJ), lambda i, j, k: (i, k)),
                      pl.BlockSpec((TJ, TN), lambda i, j, k: (k, j))],
            out_specs=pl.BlockSpec((TM, TN), lambda i, j, k: (i, j)),
            scratch_shapes=scratch,
        ),
        compiler_params=pltpu.CompilerParams(
            dimension_semantics=("parallel", "parallel", "arbitrary"),
            vmem_limit_bytes=vmem_limit),
        cost_estimate=cost,
    )(a2p, wp)
    return out[:M, :K]


# ----------------------------------------------------------------------------
# BlockedEinsum forward ("bij,jk->bik", block_dim='b')
# ----------------------------------------------------------------------------
def blocked_einsum(a, w, *, batch_size=None, mxu_input_dtype=None,
                   vmem_budget_bytes=None):
    """Pallas implementation of BlockedEinsum('bij,jk->bik', block_dim='b').

    The PyTorch module splits `a` along 'b' into `batch_size`-sized chunks,
    contracts each chunk, and concatenates along 'b'.  Because 'b' is never
    contracted, that split/concat is a numerical no-op, so the blocking is
    realized here as VMEM/MXU tiling of the flattened (B*I, J) @ (J, K)
    matmul; `batch_size` is kept for API compatibility but peak on-chip memory
    is bounded by the hardware-derived tile sizes instead.

    `mxu_input_dtype=jnp.bfloat16` feeds the MXU bf16 inputs with f32
    accumulation on ANY generation (v5e's MXU is bf16-native; the default f32
    path runs multi-pass at a fraction of bf16 throughput).  bf16 products
    differ slightly from the torch f32 einsum — use a looser tolerance.
    `vmem_budget_bytes` overrides the generation-derived VMEM tiling budget
    (mainly for testing).
    """
    del batch_size  # memory-chunking contract subsumed by the MXU/VMEM tiling
    B, I, J = a.shape
    J2, K = w.shape
    assert J == J2, "contracted dims must match"
    out_dtype = a.dtype

    if mxu_input_dtype is not None:
        a = a.astype(mxu_input_dtype)
        w = w.astype(mxu_input_dtype)

    a2 = a.reshape(B * I, J)   # free contiguous reshape in XLA (not in-kernel)
    out2 = _matmul_2d(a2, w, out_dtype, vmem_budget_bytes=vmem_budget_bytes)
    return out2.reshape(B, I, K)


# TODO(synk): the torch module is equation-generic and supports
# torch.utils.checkpoint; this kernel instantiates the representative
# 'bij,jk->bik' contraction (wrap the call in jax.checkpoint if
# rematerialization is needed).

if __name__ == "__main__":
    key = jax.random.PRNGKey(0)
    k1, k2, k3, k4, k5, k6 = jax.random.split(key, 6)

    # --- 1. small shapes consistent with the module's forward ----------------
    B, I, J, K = 2, 16, 32, 64
    a = jax.random.normal(k1, (B, I, J), dtype=jnp.float32)
    w = jax.random.normal(k2, (J, K), dtype=jnp.float32)
    out = jax.block_until_ready(blocked_einsum(a, w, batch_size=2))
    ref = jnp.einsum("bij,jk->bik", a, w)
    assert out.shape == ref.shape == (B, I, K)
    assert jnp.allclose(out, ref, atol=1e-4, rtol=1e-4)

    # --- 2. medium, aligned shapes: multi-tile grid, no padding of A ---------
    # Integer-valued inputs -> result is exact on every MXU precision path.
    Bm, Im, Jm, Km = 16, 64, 1536, 768
    a_m = jax.random.randint(k3, (Bm, Im, Jm), -3, 4).astype(jnp.float32)
    w_m = jax.random.randint(k4, (Jm, Km), -3, 4).astype(jnp.float32)
    out_m = jax.block_until_ready(blocked_einsum(a_m, w_m, batch_size=4))
    ref_m = jnp.einsum("bij,jk->bik", a_m, w_m)
    assert out_m.shape == ref_m.shape == (Bm, Im, Km)
    assert jnp.allclose(out_m, ref_m, atol=1e-3, rtol=1e-5)

    # --- 3. force the J-reduction (accumulator) path via a small VMEM budget -
    Bb, Ib, Jb, Kb = 4, 192, 1024, 512
    a_b = jax.random.randint(k5, (Bb, Ib, Jb), -3, 4).astype(jnp.float32)
    w_b = jax.random.randint(k6, (Jb, Kb), -3, 4).astype(jnp.float32)
    out_b = jax.block_until_ready(
        blocked_einsum(a_b, w_b, batch_size=64, vmem_budget_bytes=4 * 1024 * 1024))
    ref_b = jnp.einsum("bij,jk->bik", a_b, w_b)
    assert out_b.shape == ref_b.shape == (Bb, Ib, Kb)
    assert jnp.allclose(out_b, ref_b, atol=1e-3, rtol=1e-5)

    print("KERNEL_OK")
</pallas_src>

<mosaic_0001>
module attributes {stable_mosaic.version = 11 : i64} {
  func.func @_fast_matmul_kernel(%arg0: i32, %arg1: i32, %arg2: memref<32x128xf32, #tpu.memory_space<vmem>>, %arg3: memref<128x128xf32, #tpu.memory_space<vmem>>, %arg4: memref<32x128xf32, #tpu.memory_space<vmem>>) attributes {dimension_semantics = [#tpu.dimension_semantics<parallel>, #tpu.dimension_semantics<parallel>], iteration_bounds = array<i64: 1, 1>, scalar_prefetch = 0 : i64, scratch_operands = 0 : i64, tpu.core_type = #tpu.core_type<tc>, window_params = [{transform_indices = @transform_0, window_bounds = array<i64: 32, 128>}, {transform_indices = @transform_1, window_bounds = array<i64: 128, 128>}, {transform_indices = @transform_2, window_bounds = array<i64: 32, 128>}]} {
    %c0 = arith.constant 0 : index
    %c0_0 = arith.constant 0 : index
    %0 = vector.load %arg2[%c0, %c0_0] : memref<32x128xf32, #tpu.memory_space<vmem>>, vector<32x128xf32>
    %c0_1 = arith.constant 0 : index
    %c0_2 = arith.constant 0 : index
    %1 = vector.load %arg3[%c0_1, %c0_2] : memref<128x128xf32, #tpu.memory_space<vmem>>, vector<128x128xf32>
    %cst = arith.constant dense<0.000000e+00> : vector<32x128xf32>
    %2 = tpu.matmul %0, %1, %cst {dimension_numbers = #tpu.dot_dimension_numbers<[1], [0], [0], [1], [0, 0, 1, 1], [], []>} : vector<32x128xf32>, vector<128x128xf32>, vector<32x128xf32> -> vector<32x128xf32>
    %c0_3 = arith.constant 0 : index
    %c0_4 = arith.constant 0 : index
    %3 = vector.load %arg4[%c0_3, %c0_4] : memref<32x128xf32, #tpu.memory_space<vmem>>, vector<32x128xf32>
    tpu.vector_store %arg4[%c0_3, %c0_4], %2 {strides = array<i32>} : memref<32x128xf32, #tpu.memory_space<vmem>>, vector<32x128xf32>,
    return
  }
  func.func @transform_0(%arg0: i32, %arg1: i32) -> (i32, i32) {
    %c0_i32 = arith.constant 0 : i32
    %c0_i32_0 = arith.constant 0 : i32
    return %arg0, %c0_i32 : i32, i32
  }
  func.func @transform_1(%arg0: i32, %arg1: i32) -> (i32, i32) {
    %c0_i32 = arith.constant 0 : i32
    %c0_i32_0 = arith.constant 0 : i32
    return %c0_i32, %arg1 : i32, i32
  }
  func.func @transform_2(%arg0: i32, %arg1: i32) -> (i32, i32) {
    %c0_i32 = arith.constant 0 : i32
    return %arg0, %arg1 : i32, i32
  }
}

</mosaic_0001>

<bundles_post_ra>
// kernel: tpu_custom_call.1
= control target key start
LH: loop header
LB: loop body
LE: loop exit
PB: predicated region body
PF: predicated region fallthrough
CT: control target
= control target key end

     0   :  { %7 = vsyncpa [#allocation3], 0  ;;  %s415_s0 = inlined_call_operand.hbm [shape: f32[32,128], index: 0, kind: input, shape index: {}]   ;;  %s416_s1 = inlined_call_operand.hbm [shape: f32[128,128], index: 1, kind: input, shape index: {}]   ;;  %s417_s2 = inlined_call_operand.hbm [shape: f32[32,128], index: 2, kind: output, shape index: {}]  }
   0x1   :  { %8 = vsyncpa [#allocation6], 0 }
   0x2   :  { %9 = vsyncpa [#allocation4], 0  ;;  %s350_s9 = smov [#allocation2]   ;;  %s278_s13 = scalar_lea.hbm %s415_s0, 512 }
   0x3   :  { %s15_s10 = sshll.u32 %s350_s9, 4  ;;  %p279_p0 = scmp.ne.s32.totalorder %s415_s0, %s278_s13  ;;  %s16_s10 = int_to_ptr.vmem [resolvable:$true] %s15_s10 }
   0x4   :  { %p282_p1 = scmp.lt.u32.totalorder %s278_s13, %s415_s0 }
   0x6   :  { %p284_p2 = pnand %p282_p1, %p279_p0 }
   0x8   :  { %287 = shalt.err (!%p284_p2)
}
   0x9   :  { %s288_s18 = scalar_lea.vmem %s16_s10, 512  ;;  %p293_p4 = scmp.lt.s32.totalorder %s16_s10, %s16_s10 }
   0xa   :  { %p289_p3 = scmp.ne.s32.totalorder %s16_s10, %s288_s18  ;;  %p294_p5 = scmp.lt.s32.totalorder %s288_s18, %s288_s18 }
   0xc   :  { %p295_p6 = por %p294_p5, %p293_p4 }
   0xe   :  { %p296_p7 = pnand %p295_p6, %p289_p3 }
  0x10   :  { %299 = shalt.err (!%p296_p7)
}
  0x11   :  { %s351_s19 = smov 128   ;;  %s352_s20 = smov 8  }
  0x12   :  { %21 = dma.hbm_to_vmem [thread:$0]  %s415_s0, 512, %s16_s10, [#allocation3], %s351_s19, %s351_s19, %s352_s20  }
  0x13   :  { %s353_s23 = smov [#allocation5]   ;;  %s300_s27 = scalar_lea.hbm %s416_s1, 2048 }
  0x14   :  { %s27_s24 = sshll.u32 %s353_s23, 4  ;;  %p301_p8 = scmp.ne.s32.totalorder %s416_s1, %s300_s27  ;;  %s28_s24 = int_to_ptr.vmem [resolvable:$true] %s27_s24 }
  0x15   :  { %p304_p9 = scmp.lt.u32.totalorder %s300_s27, %s416_s1 }
  0x17   :  { %p306_p10 = pnand %p304_p9, %p301_p8 }
  0x19   :  { %309 = shalt.err (!%p306_p10)
}
  0x1a   :  { %s310_s4 = scalar_lea.vmem %s28_s24, 2048  ;;  %p315_p12 = scmp.lt.s32.totalorder %s28_s24, %s28_s24 }
  0x1b   :  { %p311_p11 = scmp.ne.s32.totalorder %s28_s24, %s310_s4  ;;  %p316_p13 = scmp.lt.s32.totalorder %s310_s4, %s310_s4 }
  0x1d   :  { %p317_p0 = por %p316_p13, %p315_p12 }
  0x1f   :  { %p318_p1 = pnand %p317_p0, %p311_p11 }
  0x21   :  { %321 = shalt.err (!%p318_p1)
}
  0x22   :  { %33 = dma.hbm_to_vmem [thread:$0]  %s416_s1, 2048, %s28_s24, [#allocation6], %s351_s19, %s351_s19, %s352_s20  }
  0x23   :  { %344 = dma.done.wait [#allocation3], 512  }
  0x24   :  { %345 = vsyncadd [#allocation3], 4294966784 }
  0x25   :  { %346 = dma.done.wait [#allocation6], 2048  }
  0x26   :  { %347 = vsyncadd [#allocation6], 4294965248  ;;  %v44_v0 = vld [vmem:[#allocation5] sm:$0xff]  ;;  %v45_v1 = vld [vmem:[#allocation5 + $0x8] sm:$0xff]  ;;  %s354_s1 = smov [#allocation7]  }
  0x27   :  { %v46_v2 = vld [vmem:[#allocation5 + $0x10] sm:$0xff]  ;;  %v225_v3 = vpack.c.bf16 %v45_v1, %v44_v0  ;;  %v47_v4 = vld [vmem:[#allocation5 + $0x18] sm:$0xff]  ;;  %v48_v6 = vld [vmem:[#allocation5 + $0x20] sm:$0xff]  ;;  %s154_s6 = sshll.u32 %s354_s1, 4  ;;  %s155_s6 = int_to_ptr.vmem [resolvable:$true] %s154_s6 }
  0x28   :  { %v229_v5 = vpack.c.bf16 %v47_v4, %v46_v2  ;;  %v49_v7 = vld [vmem:[#allocation5 + $0x28] sm:$0xff]  ;;  %v40_v9 = vld [vmem:[#allocation2] sm:$0xff]  ;;  %v42_v10 = vld [vmem:[#allocation2 + $0x10] sm:$0xff]  ;;  %s322_s7 = scalar_lea.vmem %s155_s6, 512  ;;  %p327_p3 = scmp.lt.s32.totalorder %s155_s6, %s155_s6 }
  0x29   :  { %226 = vmatprep.subr.bf16.mxu0 %v225_v3  ;;  %257 = vmatprep.subr.bf16.mxu1 %v225_v3  ;;  %v233_v8 = vpack.c.bf16 %v49_v7, %v48_v6  ;;  %v50_v11 = vld [vmem:[#allocation5 + $0x30] sm:$0xff]  ;;  %v51_v12 = vld [vmem:[#allocation5 + $0x38] sm:$0xff]  ;;  %v52_v14 = vld [vmem:[#allocation5 + $0x40] sm:$0xff]  ;;  %p323_p2 = scmp.ne.s32.totalorder %s155_s6, %s322_s7  ;;  %p328_p4 = scmp.lt.s32.totalorder %s322_s7, %s322_s7 }
  0x2a   :  { %228 = vmatpush3.bf16.msra.mxu0 %v225_v3  ;;  %265 = vmatpush3.bf16.msra.mxu1 %v225_v3  ;;  %v237_v13 = vpack.c.bf16 %v51_v12, %v50_v11  ;;  %v53_v15 = vld [vmem:[#allocation5 + $0x48] sm:$0xff]  ;;  %v54_v17 = vld [vmem:[#allocation5 + $0x50] sm:$0xff]  ;;  %v55_v18 = vld [vmem:[#allocation5 + $0x58] sm:$0xff] }
  0x2b   :  { %230 = vmatprep.subr.bf16.mxu0 %v229_v5  ;;  %258 = vmatprep.subr.bf16.mxu1 %v229_v5  ;;  %v241_v16 = vpack.c.bf16 %v53_v15, %v52_v14  ;;  %v245_v19 = vpack.c.bf16 %v55_v18, %v54_v17  ;;  %v56_v20 = vld [vmem:[#allocation5 + $0x60] sm:$0xff]  ;;  %v57_v21 = vld [vmem:[#allocation5 + $0x68] sm:$0xff]  ;;  %v58_v23 = vld [vmem:[#allocation5 + $0x70] sm:$0xff]  ;;  %p329_p5 = por %p328_p4, %p327_p3 }
  0x2c   :  { %219 = vmatprep.mubr.f32.mxu0 %v40_v9  ;;  %222 = vmatprep.mubr.f32.mxu1 %v42_v10  ;;  %v249_v22 = vpack.c.bf16 %v57_v21, %v56_v20  ;;  %v59_v24 = vld [vmem:[#allocation5 + $0x78] sm:$0xff]  ;;  %v41_v26 = vld [vmem:[#allocation2 + $0x8] sm:$0xff] }
  0x2d   :  { %v253_v25 = vpack.c.bf16 %v59_v24, %v58_v23  ;;  %v43_v27 = vld [vmem:[#allocation2 + $0x18] sm:$0xff]  ;;  %p330_p6 = pnand %p329_p5, %p323_p2 }
  0x2e   :  { %232 = vmatpush3.bf16.msra.mxu0 %v229_v5  ;;  %266 = vmatpush3.bf16.msra.mxu1 %v229_v5 }
  0x2f   :  { %234 = vmatprep.subr.bf16.mxu0 %v233_v8  ;;  %259 = vmatprep.subr.bf16.mxu1 %v233_v8 }
  0x32   :  { %236 = vmatpush3.bf16.msra.mxu0 %v233_v8  ;;  %267 = vmatpush3.bf16.msra.mxu1 %v233_v8 }
  0x33   :  { %238 = vmatprep.subr.bf16.mxu0 %v237_v13  ;;  %260 = vmatprep.subr.bf16.mxu1 %v237_v13 }
  0x36   :  { %240 = vmatpush3.bf16.msra.mxu0 %v237_v13  ;;  %268 = vmatpush3.bf16.msra.mxu1 %v237_v13 }
  0x37   :  { %242 = vmatprep.subr.bf16.mxu0 %v241_v16  ;;  %261 = vmatprep.subr.bf16.mxu1 %v241_v16 }
  0x3a   :  { %244 = vmatpush3.bf16.msra.mxu0 %v241_v16  ;;  %269 = vmatpush3.bf16.msra.mxu1 %v241_v16 }
  0x3b   :  { %246 = vmatprep.subr.bf16.mxu0 %v245_v19  ;;  %262 = vmatprep.subr.bf16.mxu1 %v245_v19 }
  0x3e   :  { %248 = vmatpush3.bf16.msra.mxu0 %v245_v19  ;;  %270 = vmatpush3.bf16.msra.mxu1 %v245_v19 }
  0x3f   :  { %250 = vmatprep.subr.bf16.mxu0 %v249_v22  ;;  %263 = vmatprep.subr.bf16.mxu1 %v249_v22 }
  0x42   :  { %252 = vmatpush3.bf16.msra.mxu0 %v249_v22  ;;  %271 = vmatpush3.bf16.msra.mxu1 %v249_v22 }
  0x43   :  { %254 = vmatprep.subr.bf16.mxu0 %v253_v25  ;;  %264 = vmatprep.subr.bf16.mxu1 %v253_v25 }
  0x46   :  { %256 = vmatpush3.bf16.msra.mxu0 %v253_v25  ;;  %272 = vmatpush3.bf16.msra.mxu1 %v253_v25 }
  0x49   :  { %220 = vmatmul.mubr.f32.vlgmr.msra.gmra.mrb[0].mxu0 %v41_v26  ;;  %223 = vmatmul.mubr.f32.vlgmr.msra.gmra.mrb[0].mxu1 %v43_v27 }
 0x11c   :  { %v221_v28 = vpop.f32.mrb[0].mxu0  ;;  %v224_v29 = vpop.f32.mrb[0].mxu1 }
 0x11d   :  { %146 = vst [vmem:[#allocation7 + $0x8] sm:$0xff] %v221_v28  ;;  %148 = vst [vmem:[#allocation7 + $0x18] sm:$0xff] %v224_v29  ;;  %v126_v30 = vpop.f32.mrb[1].mxu0  ;;  %v136_v31 = vpop.f32.mrb[1].mxu1 }
 0x11e   :  { %145 = vst [vmem:[#allocation7] sm:$0xff] %v126_v30  ;;  %147 = vst [vmem:[#allocation7 + $0x10] sm:$0xff] %v136_v31 }
 0x11f   :  { %333 = shalt.err (!%p330_p6)
}
 0x120   :  { %s334_s10 = scalar_lea.hbm %s417_s2, 512 }
 0x121   :  { %p335_p7 = scmp.ne.s32.totalorder %s417_s2, %s334_s10  ;;  %p338_p8 = scmp.lt.u32.totalorder %s334_s10, %s417_s2 }
 0x123   :  { %p340_p9 = pnand %p338_p8, %p335_p7 }
 0x125   :  { %343 = shalt.err (!%p340_p9)
}
 0x126   :  { %160 = dma.vmem_to_hbm [thread:$0]  %s155_s6, 512, %s417_s2, [#allocation4], %s351_s19, %s351_s19, %s352_s20  }
 0x127   :  { %348 = dma.done.wait [#allocation4], 512  }
 0x128   :  { %349 = vsyncadd [#allocation4], 4294966784 }
 0x129   :  { %164 = vsyncpa [#allocation3], 1 }
 0x12a   :  { %165 = vsyncpa [#allocation6], 1 }
 0x12b   :  { %166 = vsyncpa [#allocation4], 1 }

</bundles_post_ra>
